<compile_context>
chip_gen: v7x
topology: tpu7x:2x2x1
jax: 0.10.0
libtpu: 0.0.40
codegen_flags: <defaults>
</compile_context>

<pallas_src>
import functools

import numpy as np
import jax
import jax.numpy as jnp
from jax.experimental import pallas as pl
from jax.experimental.pallas import tpu as pltpu


# ----------------------------------------------------------------------------
# Host-side glue: PyTorch-compatible bicubic interpolation weight matrices
# (a = -0.75, align_corners=False, antialias=False, border clamping).
# ----------------------------------------------------------------------------
def _cubic1(x, A=-0.75):
    # |x| <= 1
    return ((A + 2.0) * x - (A + 3.0)) * x * x + 1.0


def _cubic2(x, A=-0.75):
    # 1 < |x| < 2
    return ((A * x - 5.0 * A) * x + 8.0 * A) * x - 4.0 * A


def bicubic_weight_matrix(in_size: int, out_size: int) -> np.ndarray:
    """M such that (M @ signal) == F.interpolate(signal, out_size, 'bicubic')
    along one axis (align_corners=False)."""
    M = np.zeros((out_size, in_size), dtype=np.float64)
    scale = in_size / out_size
    for i in range(out_size):
        src = (i + 0.5) * scale - 0.5
        idx = int(np.floor(src))
        t = src - idx
        coeffs = (
            _cubic2(t + 1.0),
            _cubic1(t),
            _cubic1(1.0 - t),
            _cubic2(2.0 - t),
        )
        for k, c in enumerate(coeffs):
            j = min(max(idx - 1 + k, 0), in_size - 1)
            M[i, j] += c
    return M


@functools.lru_cache(maxsize=None)
def _combined_matrices(H, W, down_h, down_w):
    """Fused down+up matrices: out = L_comb @ x @ R_comb (exact composition)."""
    Mh_down = bicubic_weight_matrix(H, down_h)   # (down_h, H)
    Mh_up = bicubic_weight_matrix(down_h, H)     # (H, down_h)
    Mw_down = bicubic_weight_matrix(W, down_w)   # (down_w, W)
    Mw_up = bicubic_weight_matrix(down_w, W)     # (W, down_w)
    L_comb = (Mh_up @ Mh_down).astype(np.float32)        # (H, H)
    R_comb = (Mw_up @ Mw_down).T.astype(np.float32)      # (W, W), right-multiplied
    return jnp.asarray(L_comb), jnp.asarray(R_comb)


# ----------------------------------------------------------------------------
# Pallas kernel: per grid step, B planes: out[b] = L @ (x[b] @ R)
# ----------------------------------------------------------------------------
def _make_fused_kernel(B, H, W):
    # Flatten (B, H, W) -> (B*H, W) for one large-M right matmul when the
    # merge is a pure sublane relabel (H % 8 == 0).
    flatten = (B > 1) and (H % 8 == 0)

    def kernel(left_ref, right_ref, x_ref, o_ref):
        L = left_ref[...]    # (H, H)
        R = right_ref[...]   # (W, W)
        if flatten:
            xf = x_ref[...].reshape(B * H, W)
            t = jnp.dot(xf, R, preferred_element_type=jnp.float32)  # (B*H, W)
            for b in range(B):
                tb = t[b * H:(b + 1) * H, :]
                o_ref[b] = jnp.dot(
                    L, tb, preferred_element_type=jnp.float32
                ).astype(o_ref.dtype)
        else:
            for b in range(B):
                t = jnp.dot(x_ref[b], R, preferred_element_type=jnp.float32)
                o_ref[b] = jnp.dot(
                    L, t, preferred_element_type=jnp.float32
                ).astype(o_ref.dtype)

    return kernel


def _choose_plane_batch(NC, H, W, itemsize):
    """Number of (H, W) planes per grid step, sized against a conservative
    VMEM budget (safe for v7x's 64 MiB physical VMEM)."""
    budget = 24 * 1024 * 1024
    const_bytes = 2 * (H * H + W * W) * 4            # double-buffered L and R
    per_plane = 2 * 2 * H * W * max(itemsize, 4)     # in+out, double-buffered
    cap = max(1, (budget - const_bytes) // per_plane)
    cap = int(min(cap, 16))                          # bound the in-kernel unroll
    if NC >= 2:
        cap = min(cap, max(1, NC // 2))              # >=2 grid steps for 2-TC chips
    cap = max(cap, 1)
    for b in range(cap, 0, -1):
        if NC % b == 0:
            return b
    return 1


@functools.lru_cache(maxsize=None)
def _build_fused_resize(NC, H, W, dtype_name):
    dtype = jnp.dtype(dtype_name)
    B = _choose_plane_batch(NC, H, W, dtype.itemsize)
    kernel = _make_fused_kernel(B, H, W)
    # NOTE: L/R have constant index maps; pipeline_mode=pl.Buffered(1) would
    # halve their VMEM footprint, kept at the default for maximum portability.
    call = pl.pallas_call(
        kernel,
        out_shape=jax.ShapeDtypeStruct((NC, H, W), dtype),
        grid_spec=pltpu.PrefetchScalarGridSpec(
            num_scalar_prefetch=0,
            grid=(NC // B,),
            in_specs=[
                pl.BlockSpec((H, H), lambda i: (0, 0)),
                pl.BlockSpec((W, W), lambda i: (0, 0)),
                pl.BlockSpec((B, H, W), lambda i: (i, 0, 0)),
            ],
            out_specs=pl.BlockSpec((B, H, W), lambda i: (i, 0, 0)),
        ),
        compiler_params=pltpu.CompilerParams(
            dimension_semantics=("parallel",),
            vmem_limit_bytes=48 * 1024 * 1024,
        ),
    )
    return jax.jit(call)


# ----------------------------------------------------------------------------
# Module wrapper
# ----------------------------------------------------------------------------
class Resize:
    def __init__(self, lowerbound=0.45, upperbound=0.8, seed=0):
        self.ratio = [lowerbound, upperbound]
        # Deterministic stand-in for np.random.uniform at forward time.
        # The ratio only affects the *values* of the composed (H,H)/(W,W)
        # matrices, not any JAX shape, so no recompilation across calls.
        self._rng = np.random.RandomState(seed)

    def __call__(self, image_and_cover):
        image, cover_image = image_and_cover  # cover_image unused (as in PyTorch)
        N, C, H, W = image.shape
        ratio = float(self._rng.uniform(self.ratio[0], self.ratio[1]))
        down_h = int(ratio * H)
        down_w = int(ratio * W)

        L_comb, R_comb = _combined_matrices(H, W, down_h, down_w)

        x = image.reshape(N * C, H, W)
        fn = _build_fused_resize(N * C, H, W, jnp.dtype(image.dtype).name)
        out = fn(L_comb, R_comb, x)
        return out.reshape(N, C, H, W)


if __name__ == "__main__":
    key = jax.random.PRNGKey(0)
    k1, k2 = jax.random.split(key)
    image = jax.random.uniform(k1, (2, 4, 16, 16), dtype=jnp.float32)
    cover_image = jax.random.uniform(k2, (2, 4, 16, 16), dtype=jnp.float32)

    resize = Resize(lowerbound=0.45, upperbound=0.8, seed=0)
    out = resize((image, cover_image))
    out = jax.block_until_ready(out)

    assert out.shape == image.shape, (out.shape, image.shape)
    assert bool(jnp.all(jnp.isfinite(out)))

    # Pure-JAX reference with the same (seeded) ratio: out = L @ x @ R.
    ratio_ref = float(np.random.RandomState(0).uniform(0.45, 0.8))
    dh, dw = int(ratio_ref * 16), int(ratio_ref * 16)
    L_ref, R_ref = _combined_matrices(16, 16, dh, dw)
    ref = jnp.einsum(
        "hk,nkl,lw->nhw", L_ref, image.reshape(8, 16, 16), R_ref
    ).reshape(2, 4, 16, 16)
    np.testing.assert_allclose(np.asarray(out), np.asarray(ref),
                               atol=1e-4, rtol=1e-4)

    print("KERNEL_OK")
</pallas_src>

<mosaic_0001>
module attributes {stable_mosaic.version = 11 : i64} {
  func.func @kernel(%arg0: i32, %arg1: memref<16x16xf32, #tpu.memory_space<vmem>>, %arg2: memref<16x16xf32, #tpu.memory_space<vmem>>, %arg3: memref<4x16x16xf32, #tpu.memory_space<vmem>>, %arg4: memref<4x16x16xf32, #tpu.memory_space<vmem>>) attributes {dimension_semantics = [#tpu.dimension_semantics<parallel>], iteration_bounds = array<i64: 2>, scalar_prefetch = 0 : i64, scratch_operands = 0 : i64, tpu.core_type = #tpu.core_type<tc>, window_params = [{pipeline_mode = #tpu.pipeline_mode<synchronous>, transform_indices = @transform_0, window_bounds = array<i64: 16, 16>}, {pipeline_mode = #tpu.pipeline_mode<synchronous>, transform_indices = @transform_1, window_bounds = array<i64: 16, 16>}, {transform_indices = @transform_2, window_bounds = array<i64: 4, 16, 16>}, {transform_indices = @transform_3, window_bounds = array<i64: 4, 16, 16>}]} {
    %c0 = arith.constant 0 : index
    %c0_0 = arith.constant 0 : index
    %0 = vector.load %arg1[%c0, %c0_0] : memref<16x16xf32, #tpu.memory_space<vmem>>, vector<16x16xf32>
    %c0_1 = arith.constant 0 : index
    %c0_2 = arith.constant 0 : index
    %1 = vector.load %arg2[%c0_1, %c0_2] : memref<16x16xf32, #tpu.memory_space<vmem>>, vector<16x16xf32>
    %c0_3 = arith.constant 0 : index
    %c0_4 = arith.constant 0 : index
    %c0_5 = arith.constant 0 : index
    %2 = vector.load %arg3[%c0_3, %c0_4, %c0_5] : memref<4x16x16xf32, #tpu.memory_space<vmem>>, vector<4x16x16xf32>
    %3 = vector.shape_cast %2 : vector<4x16x16xf32> to vector<64x16xf32>
    %cst = arith.constant dense<0.000000e+00> : vector<64x16xf32>
    %4 = tpu.matmul %3, %1, %cst {dimension_numbers = #tpu.dot_dimension_numbers<[1], [0], [0], [1], [0, 0, 1, 1], [], []>} : vector<64x16xf32>, vector<16x16xf32>, vector<64x16xf32> -> vector<64x16xf32>
    %5 = vector.extract_strided_slice %4 {offsets = [0, 0], sizes = [16, 16], strides = [1, 1]} : vector<64x16xf32> to vector<16x16xf32>
    %cst_6 = arith.constant dense<0.000000e+00> : vector<16x16xf32>
    %6 = tpu.matmul %0, %5, %cst_6 {dimension_numbers = #tpu.dot_dimension_numbers<[1], [0], [0], [1], [0, 0, 1, 1], [], []>} : vector<16x16xf32>, vector<16x16xf32>, vector<16x16xf32> -> vector<16x16xf32>
    %c0_7 = arith.constant 0 : index
    %c0_8 = arith.constant 0 : index
    %c0_9 = arith.constant 0 : index
    %7 = vector.load %arg4[%c0_7, %c0_8, %c0_9] : memref<4x16x16xf32, #tpu.memory_space<vmem>>, vector<1x16x16xf32>
    %8 = vector.shape_cast %7 : vector<1x16x16xf32> to vector<16x16xf32>
    %9 = vector.shape_cast %6 : vector<16x16xf32> to vector<1x16x16xf32>
    tpu.vector_store %arg4[%c0_7, %c0_8, %c0_9], %9 {strides = array<i32>} : memref<4x16x16xf32, #tpu.memory_space<vmem>>, vector<1x16x16xf32>,
    %10 = vector.extract_strided_slice %4 {offsets = [16, 0], sizes = [16, 16], strides = [1, 1]} : vector<64x16xf32> to vector<16x16xf32>
    %cst_10 = arith.constant dense<0.000000e+00> : vector<16x16xf32>
    %11 = tpu.matmul %0, %10, %cst_10 {dimension_numbers = #tpu.dot_dimension_numbers<[1], [0], [0], [1], [0, 0, 1, 1], [], []>} : vector<16x16xf32>, vector<16x16xf32>, vector<16x16xf32> -> vector<16x16xf32>
    %c1 = arith.constant 1 : index
    %c0_11 = arith.constant 0 : index
    %c0_12 = arith.constant 0 : index
    %12 = vector.load %arg4[%c1, %c0_11, %c0_12] : memref<4x16x16xf32, #tpu.memory_space<vmem>>, vector<1x16x16xf32>
    %13 = vector.shape_cast %12 : vector<1x16x16xf32> to vector<16x16xf32>
    %14 = vector.shape_cast %11 : vector<16x16xf32> to vector<1x16x16xf32>
    tpu.vector_store %arg4[%c1, %c0_11, %c0_12], %14 {strides = array<i32>} : memref<4x16x16xf32, #tpu.memory_space<vmem>>, vector<1x16x16xf32>,
    %15 = vector.extract_strided_slice %4 {offsets = [32, 0], sizes = [16, 16], strides = [1, 1]} : vector<64x16xf32> to vector<16x16xf32>
    %cst_13 = arith.constant dense<0.000000e+00> : vector<16x16xf32>
    %16 = tpu.matmul %0, %15, %cst_13 {dimension_numbers = #tpu.dot_dimension_numbers<[1], [0], [0], [1], [0, 0, 1, 1], [], []>} : vector<16x16xf32>, vector<16x16xf32>, vector<16x16xf32> -> vector<16x16xf32>
    %c2 = arith.constant 2 : index
    %c0_14 = arith.constant 0 : index
    %c0_15 = arith.constant 0 : index
    %17 = vector.load %arg4[%c2, %c0_14, %c0_15] : memref<4x16x16xf32, #tpu.memory_space<vmem>>, vector<1x16x16xf32>
    %18 = vector.shape_cast %17 : vector<1x16x16xf32> to vector<16x16xf32>
    %19 = vector.shape_cast %16 : vector<16x16xf32> to vector<1x16x16xf32>
    tpu.vector_store %arg4[%c2, %c0_14, %c0_15], %19 {strides = array<i32>} : memref<4x16x16xf32, #tpu.memory_space<vmem>>, vector<1x16x16xf32>,
    %20 = vector.extract_strided_slice %4 {offsets = [48, 0], sizes = [16, 16], strides = [1, 1]} : vector<64x16xf32> to vector<16x16xf32>
    %cst_16 = arith.constant dense<0.000000e+00> : vector<16x16xf32>
    %21 = tpu.matmul %0, %20, %cst_16 {dimension_numbers = #tpu.dot_dimension_numbers<[1], [0], [0], [1], [0, 0, 1, 1], [], []>} : vector<16x16xf32>, vector<16x16xf32>, vector<16x16xf32> -> vector<16x16xf32>
    %c3 = arith.constant 3 : index
    %c0_17 = arith.constant 0 : index
    %c0_18 = arith.constant 0 : index
    %22 = vector.load %arg4[%c3, %c0_17, %c0_18] : memref<4x16x16xf32, #tpu.memory_space<vmem>>, vector<1x16x16xf32>
    %23 = vector.shape_cast %22 : vector<1x16x16xf32> to vector<16x16xf32>
    %24 = vector.shape_cast %21 : vector<16x16xf32> to vector<1x16x16xf32>
    tpu.vector_store %arg4[%c3, %c0_17, %c0_18], %24 {strides = array<i32>} : memref<4x16x16xf32, #tpu.memory_space<vmem>>, vector<1x16x16xf32>,
    return
  }
  func.func @transform_0(%arg0: i32) -> (i32, i32) {
    %c0_i32 = arith.constant 0 : i32
    %c0_i32_0 = arith.constant 0 : i32
    %c0_i32_1 = arith.constant 0 : i32
    return %c0_i32, %c0_i32_0 : i32, i32
  }
  func.func @transform_1(%arg0: i32) -> (i32, i32) {
    %c0_i32 = arith.constant 0 : i32
    %c0_i32_0 = arith.constant 0 : i32
    %c0_i32_1 = arith.constant 0 : i32
    return %c0_i32, %c0_i32_0 : i32, i32
  }
  func.func @transform_2(%arg0: i32) -> (i32, i32, i32) {
    %c0_i32 = arith.constant 0 : i32
    %c0_i32_0 = arith.constant 0 : i32
    %c0_i32_1 = arith.constant 0 : i32
    return %arg0, %c0_i32, %c0_i32_0 : i32, i32, i32
  }
  func.func @transform_3(%arg0: i32) -> (i32, i32, i32) {
    %c0_i32 = arith.constant 0 : i32
    %c0_i32_0 = arith.constant 0 : i32
    %c0_i32_1 = arith.constant 0 : i32
    return %arg0, %c0_i32, %c0_i32_0 : i32, i32, i32
  }
}

</mosaic_0001>

<bundles_post_ra>
// kernel: tpu_custom_call.1
= control target key start
LH: loop header
LB: loop body
LE: loop exit
PB: predicated region body
PF: predicated region fallthrough
CT: control target
= control target key end

     0   :  { %8 = vsyncpa [#allocation3], 0  ;;  %s1451_s0 = inlined_call_operand.hbm [shape: f32[16,16], index: 0, kind: input, shape index: {}]   ;;  %s1452_s1 = inlined_call_operand.hbm [shape: f32[16,16], index: 1, kind: input, shape index: {}]   ;;  %s1453_s2 = inlined_call_operand.hbm [shape: f32[8,16,16], index: 2, kind: input, shape index: {}]   ;;  %s1454_s3 = inlined_call_operand.hbm [shape: f32[8,16,16], index: 3, kind: output, shape index: {}]  }
   0x1   :  { %9 = vsyncpa [#allocation6], 0 }
   0x2   :  { %10 = vsyncpa [#allocation4], 0 }
   0x3   :  { %12 = vsyncpa [#allocation4 + $0x1], 0  ;;  %s1182_s12 = smov 0   ;;  %s1184_s13 = smov 0  }
   0x4   :  { %s1186_s14 = smov 0   ;;  %s1188_s15 = smov 0  }
   0x5 LB: > { %s1203_s16 = sadd.s32 4294967295, %s1152_s15   ;;  %s785_s17 = sadd.s32 4294967294, %s1152_s15   ;;  %s1152_s15 = sphi %s1188_s15, %s1482_s15   ;;  %s1148_s14 = sphi %s1186_s14, %s1481_s14   ;;  %s1144_s13 = sphi %s1184_s13, %s1480_s13   ;;  %s1140_s12 = sphi %s1182_s12, %s1479_s12  }
   0x6   : > { %s1207_s18 = sadd.s32 1, %s1152_s15   ;;  %s67_s19 = sadd.s32 1, %s1148_s14 }
   0x7   : > { %s64_s20 = ssub.s32 %s1152_s15, %s1207_s18  ;;  %p74_p0 = scmp.ne.s32.totalorder %s1148_s14, %s1144_s13 }
   0x8   : > { %p65_p1 = scmp.eq.s32.totalorder %s64_s20, 0  ;;  %p75_p2 = scmp.eq.s32.totalorder %s1152_s15, 0 }
   0x9   : > { %p80_p3 = scmp.ne.s32.totalorder %s1144_s13, %s1140_s12  ;;  %p1455_p4 = scmp.eq.s32.totalorder %s1203_s16, 0 }
   0xa   : > { %s1219_s21 = scalar_select %p65_p1, %s1148_s14, %s67_s19  }
   0xb   : > { %p1221_p5 = por %p75_p2, %p74_p0  ;;  %p1227_p6 = por %p1455_p4, %p80_p3 }
   0xc   : > { %p104_p7 = scmp.eq.s32.totalorder %s1203_s16, 1  ;;  %p110_p8 = scmp.eq.s32.totalorder %s785_s17, 1 }
   0xd   : > { %s1460_s22 = scalar_select %p1221_p5, 1, 0 }
   0xe   : > { %s1461_s23 = scalar_select %p1227_p6, 1, 0 }
   0xf   : > { %p786_p9 = scmp.ge.s32.totalorder %s1152_s15, 1  ;;  %p117_p10 = scmp.lt.s32.totalorder %s1152_s15, 3 }
  0x10   : > { %p1234_p11 = por %p104_p7, %p74_p0  ;;  %p1238_p12 = por %p110_p8, %p80_p3 }
  0x11   : > { %p1242_p13 = pnand %p786_p9, %p117_p10  ;;  %s1154_s27 = smov [#allocation2]  }
  0x12   : > { %s1462_s24 = scalar_select %p1234_p11, 1, 0 }
  0x13   : > { %s1463_s25 = scalar_select %p1238_p12, 1, 0 }
  0x14   : > { %s1464_s26 = scalar_select %p1242_p13, 1, 0 }
  0x15   : > { %p933_p1 = pneg %p1242_p13  ;;  %s129_s28 = sshll.u32 %s1154_s27, 4  ;;  %s130_s28 = int_to_ptr.vmem [resolvable:$true] %s129_s28 }
  0x16   : > { %s1155_s30 = smov [#allocation5]   ;;  %s992_s7 = scalar_lea.hbm %s1451_s0, 256 }
  0x17   : > { %p1250_p2 = pnand %p933_p1, %p1455_p4  ;;  %s142_s4 = sshll.u32 %s1155_s30, 4  ;;  %s143_s4 = int_to_ptr.vmem [resolvable:$true] %s142_s4 }
  0x18   : > { %p993_p7 = scmp.ne.s32.totalorder %s1451_s0, %s992_s7  ;;  %p999_p1 = scmp.lt.u32.totalorder %s992_s7, %s1451_s0 }
  0x19   : > { %p994_p8 = pneg %p1250_p2 }
  0x1b   : > { %p995_p9 = pnand %p994_p8, %p993_p7 }
  0x1d   : > { %p996_p10 = pneg %p995_p9 }
  0x1f   : > { %p1001_p0 = pnand %p999_p1, %p996_p10 }
  0x21   : > { %1004 = shalt.err (!%p1001_p0)
}
  0x22   : > { %s1005_s17 = scalar_lea.vmem %s130_s28, 256  ;;  %p1013_p11 = scmp.lt.s32.totalorder %s130_s28, %s130_s28 }
  0x23   : > { %p1006_p4 = scmp.ne.s32.totalorder %s130_s28, %s1005_s17  ;;  %p1014_p6 = scmp.lt.s32.totalorder %s1005_s17, %s1005_s17 }
  0x25   : > { %p1008_p3 = pnand %p1006_p4, %p994_p8  ;;  %p1015_p13 = por %p1014_p6, %p1013_p11 }
  0x27   : > { %p1009_p12 = pneg %p1008_p3 }
  0x29   : > { %p1016_p5 = pnand %p1015_p13, %p1009_p12 }
  0x2b   : > { %1019 = shalt.err (!%p1016_p5)
}
  0x2c   : > { %s1156_s19 = smov 128   ;;  %s1157_s20 = smov 8  }
  0x2d   : > { %936 = dma.hbm_to_vmem [thread:$0]  (!%p1250_p2), %s1451_s0, 256, %s130_s28, [#allocation3], %s1156_s19, %s1156_s19, %s1157_s20  }
  0x2e   : > { %p1466_p4 = scmp.ne.s32.totalorder %s1460_s22, 0  ;;  %p1467_p0 = scmp.lt.s32.totalorder %s1152_s15, 2 }
  0x2f   : > { %s1020_s8 = scalar_lea.hbm %s1452_s1, 256 }
  0x30   : > { %p1285_p3 = pnand %p1467_p0, %p1466_p4  ;;  %p1021_p5 = scmp.ne.s32.totalorder %s1452_s1, %s1020_s8 }
  0x31   : > { %p1027_p12 = scmp.lt.u32.totalorder %s1020_s8, %s1452_s1 }
  0x32   : > { %s1468_s5 = scalar_select %p1285_p3, 1, 0 }
  0x33   : > { %p1023_p6 = pnand %p1021_p5, %p994_p8 }
  0x35   : > { %p1024_p11 = pneg %p1023_p6 }
  0x37   : > { %p1029_p13 = pnand %p1027_p12, %p1024_p11 }
  0x39   : > { %1032 = shalt.err (!%p1029_p13)
}
  0x3a   : > { %s1033_s11 = scalar_lea.vmem %s143_s4, 256  ;;  %p1041_p1 = scmp.lt.s32.totalorder %s143_s4, %s143_s4 }
  0x3b   : > { %p1034_p7 = scmp.ne.s32.totalorder %s143_s4, %s1033_s11  ;;  %p1042_p4 = scmp.lt.s32.totalorder %s1033_s11, %s1033_s11 }
  0x3d   : > { %p1036_p9 = pnand %p1034_p7, %p994_p8  ;;  %p1043_p0 = por %p1042_p4, %p1041_p1 }
  0x3f   : > { %p1037_p10 = pneg %p1036_p9 }
  0x41   : > { %p1044_p3 = pnand %p1043_p0, %p1037_p10 }
  0x43   : > { %1047 = shalt.err (!%p1044_p3)
}
  0x44   : > { %939 = dma.hbm_to_vmem [thread:$0]  (!%p1250_p2), %s1452_s1, 256, %s143_s4, [#allocation6], %s1156_s19, %s1156_s19, %s1157_s20  }
  0x45   : > { %s156_s30 = sand.u32 1, %s1152_s15   ;;  %s158_s6 = sand.u32 1, %s1148_s14  }
  0x46   : > { %s790_s7 = sshll.u32 %s158_s6, 6  ;;  %s828_s8 = sshll.u32 %s1152_s15, 10 }
  0x47   : > { %s1318_s29 = scalar_lea.hbm %s1453_s2, %s828_s8  ;;  %s160_s28 = scalar_lea.vmem [#allocation7], %s790_s7 }
  0x48   : > { %s168_s22 = sshll.u32 %s160_s28, 4  ;;  %s1322_s11 = scalar_lea.sflag [#allocation3], %s156_s30  ;;  %s1320_s22 = int_to_ptr.vmem [resolvable:$true] %s168_s22 }
  0x49   : > { %s1048_s4 = scalar_lea.hbm %s1318_s29, 1024  ;;  %p1469_p8 = scmp.ne.s32.totalorder %s1468_s5, 0 }
  0x4a   : > { %p1049_p2 = scmp.ne.s32.totalorder %s1318_s29, %s1048_s4  ;;  %s1053_s6 = scalar_lea.hbm %s1453_s2, 2048 }
  0x4b   : > { %p1050_p3 = pneg %p1469_p8  ;;  %p1054_p11 = scmp.lt.u32.totalorder %s1318_s29, %s1453_s2 }
  0x4c   : > { %p1055_p12 = scmp.lt.u32.totalorder %s1053_s6, %s1048_s4  ;;  %p1057_p7 = scmp.lt.u32.totalorder %s1048_s4, %s1318_s29 }
  0x4d   : > { %p1051_p5 = pnand %p1050_p3, %p1049_p2 }
  0x4e   : > { %p1056_p13 = por %p1055_p12, %p1054_p11 }
  0x4f   : > { %p1052_p6 = pneg %p1051_p5 }
  0x50   : > { %p1058_p9 = por %p1057_p7, %p1056_p13 }
  0x52   : > { %p1059_p10 = pnand %p1058_p9, %p1052_p6 }
  0x54   : > { %1062 = shalt.err (!%p1059_p10)
}
  0x55   : > { %s1063_s30 = scalar_lea.vmem %s1320_s22, 1024  ;;  %s1158_s7 = smov [#allocation7]  }
  0x56   : > { %p1064_p1 = scmp.ne.s32.totalorder %s1320_s22, %s1063_s30  ;;  %s1068_s10 = sshll.u32 %s1158_s7, 4  ;;  %s1069_s10 = int_to_ptr.vmem [resolvable:$false] %s1068_s10 }
  0x57   : > { %s1070_s28 = scalar_lea.vmem %s1069_s10, 2048  ;;  %p1071_p2 = scmp.lt.s32.totalorder %s1320_s22, %s1069_s10 }
  0x58   : > { %p1066_p4 = pnand %p1064_p1, %p1050_p3  ;;  %p1072_p5 = scmp.lt.s32.totalorder %s1070_s28, %s1063_s30 }
  0x5a   : > { %p1067_p0 = pneg %p1066_p4  ;;  %p1073_p11 = por %p1072_p5, %p1071_p2 }
  0x5c   : > { %p1074_p12 = pnand %p1073_p11, %p1067_p0 }
  0x5e   : > { %1077 = shalt.err (!%p1074_p12)
}
  0x5f   : > { %943 = dma.hbm_to_vmem [thread:$0]  (!%p1469_p8), %s1318_s29, 1024, %s1320_s22, %s1322_s11, %s1156_s19, %s1156_s19, %s1157_s20  }
  0x60   : > { %p1470_p3 = scmp.ne.s32.totalorder %s1464_s26, 0 }
  0x61   : > { %p1471_p6 = scmp.eq.s32.totalorder (!%p1470_p3), %s1203_s16, 0 }
  0x62   : > { %180 = sbr.rel (%p1470_p3) target bundleno = 580 (0x244), region = 32 }
  0x69   : > { %1123 = dma.done.wait (%p1471_p6), [#allocation3], 256   ;;  %p1472_p13 = pmov %p1471_p6 }
  0x6a   : > { %p1473_p7 = pmov %p1471_p6 }
  0x6b   : > { %1125 = vsyncadd (%p1472_p13), [#allocation3], 4294967040 }
  0x6c   : > { %1127 = dma.done.wait (%p1473_p7), [#allocation6], 256   ;;  %p1474_p9 = pmov %p1471_p6 }
  0x6d   : > { %s190_s19 = sand.u32 1, %s1203_s16   ;;  %s192_s20 = sand.u32 1, %s1144_s13  }
  0x6e   : > { %1129 = vsyncadd (%p1474_p9), [#allocation6], 4294967040  ;;  %s1367_s26 = sshll.u32 %s192_s20, 6  ;;  %s191_s5 = scalar_lea.sflag [#allocation3], %s190_s19 }
  0x6f   : > { %s194_s29 = scalar_lea.vmem [#allocation7], %s1367_s26  ;;  %p1475_p8 = scmp.ne.s32.totalorder %s1461_s23, 0 }
  0x71   : > { %1131 = dma.done.wait (%p1475_p8), %s191_s5, 1024  }
  0x72   : > { %1133 = vsyncadd (%p1475_p8), %s191_s5, 4294966272  ;;  %vm231_vm0 = vcmask 130048   ;;  %v221_v0 = vld [vmem:[#allocation5] sm:$0xff]  ;;  %v222_v1 = vld [vmem:[#allocation5 + $0x8] sm:$0xff]  ;;  %s216_s23 = scalar_lea.vmem [#allocation8], %s1367_s26  ;;  %s830_s11 = sshll.u32 %s1203_s16, 10 }
  0x73   : > { %v223_v2 = vld [vmem:[%s194_s29] sm:$0xff]  ;;  %v901_v3 = vpack.c.bf16 %v222_v1, %v221_v0  ;;  %v224_v4 = vld [vmem:[%s194_s29 + $0x8] sm:$0xff]  ;;  %v225_v5 = vld [vmem:[%s194_s29 + $0x10] sm:$0xff]  ;;  %s693_s22 = sshll.u32 %s216_s23, 4  ;;  %s1403_s27 = scalar_lea.hbm %s1454_s3, %s830_s11  ;;  %s1397_s22 = int_to_ptr.vmem [resolvable:$true] %s693_s22 }
  0x74   : > { %861 = vmatprep.mubr.msk.f32.mxu0 %vm231_vm0, %v223_v2  ;;  %v226_v6 = vld [vmem:[%s194_s29 + $0x18] sm:$0xff]  ;;  %v227_v7 = vld [vmem:[%s194_s29 + $0x20] sm:$0xff]  ;;  %v228_v8 = vld [vmem:[%s194_s29 + $0x28] sm:$0xff]  ;;  %s1409_s16 = scalar_lea.sflag [#allocation4], %s192_s20  ;;  %s1078_s6 = scalar_lea.vmem %s1397_s22, 1024 }
  0x75   : > { %902 = vmatprep.subr.bf16.mxu0 %v901_v3  ;;  %v229_v9 = vld [vmem:[%s194_s29 + $0x30] sm:$0xff]  ;;  %v230_v10 = vld [vmem:[%s194_s29 + $0x38] sm:$0xff]  ;;  %v219_v11 = vld [vmem:[#allocation2] sm:$0xff]  ;;  %p1079_p10 = scmp.ne.s32.totalorder %s1397_s22, %s1078_s6  ;;  %p1476_p1 = scmp.ne.s32.totalorder %s1462_s24, 0 }
  0x76   : > { %904 = vmatpush3.bf16.msra.mxu0 %v901_v3  ;;  %877 = vmatprep.mubr.msk.f32.mxu1 %vm231_vm0, %v219_v11  ;;  %v220_v17 = vld [vmem:[#allocation2 + $0x8] sm:$0xff]  ;;  %s1159_s8 = smov [#allocation8]  }
  0x77   : > { %p1080_p4 = pnand %p1079_p10, %p1476_p1  ;;  %s1082_s9 = sshll.u32 %s1159_s8, 4  ;;  %s1083_s9 = int_to_ptr.vmem [resolvable:$false] %s1082_s9 }
  0x78   : > { %s1084_s30 = scalar_lea.vmem %s1083_s9, 2048  ;;  %p1085_p2 = scmp.lt.s32.totalorder %s1397_s22, %s1083_s9 }
  0x79   : > { %862 = vmatmul.mubr.msk.f32.vlgmr.msra.gmra.mrb[0].mxu0 %vm231_vm0, %v224_v4  ;;  %p1081_p0 = pneg %p1080_p4  ;;  %p1086_p5 = scmp.lt.s32.totalorder %s1084_s30, %s1078_s6 }
  0x7a   : > { %864 = vmatprep.mubr.msk.f32.mxu0 %vm231_vm0, %v225_v5 }
  0x7b   : > { %p1087_p11 = por %p1086_p5, %p1085_p2 }
  0x7d   : > { %865 = vmatmul.mubr.msk.f32.gmra.mrb[2].mxu0 %vm231_vm0, %v226_v6  ;;  %p1088_p12 = pnand %p1087_p11, %p1081_p0 }
  0x7e   : > { %867 = vmatprep.mubr.msk.f32.mxu0 %vm231_vm0, %v227_v7 }
  0x81   : > { %868 = vmatmul.mubr.msk.f32.gmra.mrb[4].mxu0 %vm231_vm0, %v228_v8 }
  0x82   : > { %870 = vmatprep.mubr.msk.f32.mxu0 %vm231_vm0, %v229_v9 }
  0x85   : > { %871 = vmatmul.mubr.msk.f32.gmra.mrb[6].mxu0 %vm231_vm0, %v230_v10 }
 0x14c   : > { %v863_v12 = vpop.f32.mrb[0].mxu0 }
 0x14d   : > { %v322_v13 = vpop.f32.mrb[1].mxu0 }
 0x14e   : > { %v905_v14 = vpack.c.bf16 %v863_v12, %v322_v13 }
 0x150   : > { %v866_v15 = vpop.f32.mrb[2].mxu0  ;;  %906 = vmatprep.subr.bf16.mxu1 %v905_v14 }
 0x151   : > { %v332_v16 = vpop.f32.mrb[3].mxu0  ;;  %908 = vmatpush3.bf16.msra.mxu1 %v905_v14 }
 0x152   : > { %v909_v18 = vpack.c.bf16 %v866_v15, %v332_v16 }
 0x154   : > { %v869_v19 = vpop.f32.mrb[4].mxu0  ;;  %878 = vmatmul.mubr.msk.f32.vlgmr.msra.gmra.mrb[0].mxu1 %vm231_vm0, %v220_v17  ;;  %910 = vmatprep.subr.bf16.mxu1 %v909_v18 }
 0x155   : > { %v342_v20 = vpop.f32.mrb[5].mxu0  ;;  %912 = vmatpush3.bf16.msra.mxu1 %v909_v18  ;;  %884 = vmatprep.mubr.msk.f32.mxu1 %vm231_vm0, %v219_v11 }
 0x156   : > { %v913_v21 = vpack.c.bf16 %v869_v19, %v342_v20 }
 0x158   : > { %v872_v22 = vpop.f32.mrb[6].mxu0  ;;  %885 = vmatmul.mubr.msk.f32.vlgmr.msra.gmra.mrb[2].mxu1 %vm231_vm0, %v220_v17  ;;  %914 = vmatprep.subr.bf16.mxu1 %v913_v21 }
 0x159   : > { %v352_v23 = vpop.f32.mrb[7].mxu0  ;;  %916 = vmatpush3.bf16.msra.mxu1 %v913_v21  ;;  %891 = vmatprep.mubr.msk.f32.mxu1 %vm231_vm0, %v219_v11 }
 0x15a   : > { %v917_v24 = vpack.c.bf16 %v872_v22, %v352_v23 }
 0x15c   : > { %892 = vmatmul.mubr.msk.f32.vlgmr.msra.gmra.mrb[4].mxu1 %vm231_vm0, %v220_v17  ;;  %918 = vmatprep.subr.bf16.mxu1 %v917_v24 }
 0x15d   : > { %920 = vmatpush3.bf16.msra.mxu1 %v917_v24  ;;  %898 = vmatprep.mubr.msk.f32.mxu1 %vm231_vm0, %v219_v11 }
 0x160   : > { %899 = vmatmul.mubr.msk.f32.vlgmr.msra.gmra.mrb[6].mxu1 %vm231_vm0, %v220_v17 }
 0x227   : > { %v879_v25 = vpop.f32.mrb[0].mxu1 }
 0x228   : > { %443 = vst.msk [vmem:[%s216_s23 + $0x8] sm:$0xff] %vm231_vm0, %v879_v25  ;;  %v433_v26 = vpop.f32.mrb[1].mxu1 }
 0x229   : > { %442 = vst.msk [vmem:[%s216_s23] sm:$0xff] %vm231_vm0, %v433_v26 }
 0x22b   : > { %v886_v27 = vpop.f32.mrb[2].mxu1 }
 0x22c   : > { %812 = vst.msk [vmem:[%s216_s23 + $0x18] sm:$0xff] %vm231_vm0, %v886_v27  ;;  %v510_v28 = vpop.f32.mrb[3].mxu1 }
 0x22d   : > { %811 = vst.msk [vmem:[%s216_s23 + $0x10] sm:$0xff] %vm231_vm0, %v510_v28 }
 0x22f   : > { %v893_v29 = vpop.f32.mrb[4].mxu1 }
 0x230   : > { %816 = vst.msk [vmem:[%s216_s23 + $0x28] sm:$0xff] %vm231_vm0, %v893_v29  ;;  %v588_v30 = vpop.f32.mrb[5].mxu1 }
 0x231   : > { %815 = vst.msk [vmem:[%s216_s23 + $0x20] sm:$0xff] %vm231_vm0, %v588_v30 }
 0x233   : > { %v900_v31 = vpop.f32.mrb[6].mxu1 }
 0x234   : > { %820 = vst.msk [vmem:[%s216_s23 + $0x38] sm:$0xff] %vm231_vm0, %v900_v31  ;;  %v666_v32 = vpop.f32.mrb[7].mxu1 }
 0x235   : > { %819 = vst.msk [vmem:[%s216_s23 + $0x30] sm:$0xff] %vm231_vm0, %v666_v32 }
 0x236   : > { %1091 = shalt.err (!%p1088_p12)
}
 0x237   : > { %s1092_s7 = scalar_lea.hbm %s1403_s27, 1024  ;;  %s1096_s19 = scalar_lea.hbm %s1454_s3, 2048 }
 0x238   : > { %p1093_p3 = scmp.ne.s32.totalorder %s1403_s27, %s1092_s7  ;;  %p1097_p7 = scmp.lt.u32.totalorder %s1403_s27, %s1454_s3 }
 0x239   : > { %p1098_p9 = scmp.lt.u32.totalorder %s1096_s19, %s1092_s7  ;;  %p1100_p10 = scmp.lt.u32.totalorder %s1092_s7, %s1403_s27 }
 0x23a   : > { %p1094_p6 = pnand %p1093_p3, %p1476_p1 }
 0x23b   : > { %p1099_p8 = por %p1098_p9, %p1097_p7 }
 0x23c   : > { %p1095_p13 = pneg %p1094_p6 }
 0x23d   : > { %p1101_p4 = por %p1100_p10, %p1099_p8 }
 0x23f   : > { %p1102_p0 = pnand %p1101_p4, %p1095_p13 }
 0x241   : > { %1105 = shalt.err (!%p1102_p0)
}
 0x242   : > { %s1160_s5 = smov 128   ;;  %s1161_s29 = smov 8  }
 0x243   : > { %931 = dma.vmem_to_hbm [thread:$0]  (%p1476_p1), %s1397_s22, 1024, %s1403_s27, %s1409_s16, %s1160_s5, %s1160_s5, %s1161_s29  }
 0x244 PF: > { %s708_s23 = sand.u32 1, %s1140_s12   ;;  %p1477_p2 = scmp.ne.s32.totalorder %s1463_s25, 0 }
 0x245   : > { %p1478_p5 = scmp.ge.s32.totalorder %s1152_s15, 2  ;;  %s709_s11 = scalar_lea.sflag [#allocation4], %s708_s23 }
 0x247   : > { %p945_p11 = pnand %p1478_p5, %p1477_p2 }
 0x249   : > { %1135 = dma.done.wait (!%p945_p11), %s709_s11, 1024  }
 0x24a   : > { %1137 = vsyncadd (!%p945_p11), %s709_s11, 4294966272  ;;  %p15_p12 = scmp.ge.s32.totalorder %s1207_s18, 4   ;;  %s1479_s12 = smov %s1144_s13 }
 0x24b   : > { %s1480_s13 = smov %s1148_s14  ;;  %s1481_s14 = smov %s1219_s21 }
 0x24c   : > { %s1482_s15 = smov %s1207_s18  ;;  %17 = sbr.rel (!%p15_p12) target bundleno = 5 (0x5), region = 87 }
 0x253   :  { %714 = vsyncpa [#allocation3], 1 }
 0x254   :  { %716 = vsyncpa [#allocation3 + $0x1], 1 }
 0x255   :  { %717 = vsyncpa [#allocation6], 1 }
 0x256   :  { %718 = vsyncpa [#allocation4], 1 }
 0x257   :  { %720 = vsyncpa [#allocation4 + $0x1], 1 }

</bundles_post_ra>
